<compile_context>
chip_gen: v7x
topology: tpu7x:2x2x1
jax: 0.10.0
libtpu: 0.0.40
codegen_flags: <defaults>
</compile_context>

<pallas_src>
import jax
import jax.numpy as jnp
from jax.experimental import pallas as pl
from jax.experimental.pallas import tpu as pltpu

_LANES = 128     # vreg lane width: W / output blocks occupy 128 lanes in VMEM
_SUBLANES = 8    # f32 sublane granularity (block batch dim must be 8-aligned)
_N_BUF = 2       # BlockSpec default double-buffering depth


def _head_kernel(x_ref, w_ref, b_ref, o_ref):
    # Hot path: ReLU (VPU) -> matmul (MXU, f32 accumulation) -> bias add.
    x = jnp.maximum(x_ref[...], 0)
    acc = jnp.dot(x, w_ref[...], preferred_element_type=jnp.float32)
    o_ref[...] = (acc + b_ref[...]).astype(o_ref.dtype)


def _vmem_budget_bytes():
    """Per-generation VMEM budget for this kernel (and the scoped limit to request)."""
    try:
        info = pltpu.get_tpu_info()
        phys = getattr(info, "vmem_capacity_bytes", 64 << 20)
    except Exception:
        phys = 64 << 20                    # conservative: v7x has the smallest VMEM
    budget = min(phys // 4, 16 << 20)      # data budget: <= quarter of physical, <= 16 MiB
    vmem_limit = min(phys // 2, 32 << 20)  # scoped-VMEM limit requested from Mosaic
    return budget, vmem_limit


def _derive_tile_b(B, D, x_itemsize, out_itemsize, budget):
    """Batch tile sized from the VMEM budget; 8-aligned; grid >= 2 when B allows."""
    if B < _SUBLANES:
        return B  # full-extent block (always legal)

    # Fixed VMEM cost: lane-padded W (double-buffered) + bias block.
    fixed = _N_BUF * D * _LANES * 4 + _SUBLANES * _LANES * 4
    avail = max(budget - fixed, 1 << 20)
    # Per batch-row cost: X row + lane-padded output row, each double-buffered.
    per_row = _N_BUF * (D * x_itemsize + _LANES * out_itemsize)
    tile_b = max(_SUBLANES, (avail // per_row) // _SUBLANES * _SUBLANES)

    # Never larger than the batch itself (rounded up to a sublane group).
    b_up = ((B + _SUBLANES - 1) // _SUBLANES) * _SUBLANES
    tile_b = min(tile_b, b_up)

    # Keep >= 2 grid steps so v7x's two TensorCores both get work
    # (costs one extra ~0.35us step on single-TC v5e/v6e -- negligible).
    if B >= 2 * _SUBLANES:
        half = (B + 1) // 2
        half_up = ((half + _SUBLANES - 1) // _SUBLANES) * _SUBLANES
        tile_b = min(tile_b, half_up)
    return tile_b


def model_head(x, W, b):
    B, D = x.shape
    Dw, O = W.shape
    assert D == Dw
    out_dtype = x.dtype
    b2 = b.reshape(1, O).astype(jnp.float32)  # bias added on the f32 accumulator

    budget, vmem_limit = _vmem_budget_bytes()
    tile_b = _derive_tile_b(
        B, D, jnp.dtype(x.dtype).itemsize, jnp.dtype(out_dtype).itemsize, budget
    )
    grid = (pl.cdiv(B, tile_b),)  # ragged last block is masked on writeback

    cost = pl.CostEstimate(
        flops=2 * B * D * O,
        transcendentals=0,
        bytes_accessed=(
            B * D * jnp.dtype(x.dtype).itemsize
            + D * O * jnp.dtype(W.dtype).itemsize
            + O * 4
            + B * O * jnp.dtype(out_dtype).itemsize
        ),
    )

    return pl.pallas_call(
        _head_kernel,
        out_shape=jax.ShapeDtypeStruct((B, O), out_dtype),
        grid_spec=pl.GridSpec(
            grid=grid,
            in_specs=[
                # X: tiled over batch -> double-buffered DMA overlaps compute.
                pl.BlockSpec((tile_b, D), lambda i: (i, 0)),
                # W, b: constant block index -> fetched once, VMEM-resident.
                pl.BlockSpec((D, O), lambda i: (0, 0)),
                pl.BlockSpec((1, O), lambda i: (0, 0)),
            ],
            out_specs=pl.BlockSpec((tile_b, O), lambda i: (i, 0)),
        ),
        compiler_params=pltpu.CompilerParams(
            # Batch tiles are independent -> shard across v7x's 2 TCs.
            dimension_semantics=("parallel",),
            vmem_limit_bytes=vmem_limit,
        ),
        cost_estimate=cost,
    )(x, W, b2)


if __name__ == "__main__":
    key = jax.random.PRNGKey(0)
    kx, kw, kx2, kx3 = jax.random.split(key, 4)

    batch, dim_in, n_out = 8, 32, 10

    # Deterministic parameter init matching nn.Parameter(torch.empty(dim_in,10)
    # .uniform_(-sqrt(6/(dim_in+10)), sqrt(6/(dim_in+10)))) and zeros bias.
    limit = jnp.sqrt(6.0 / (dim_in + n_out))
    W = jax.random.uniform(kw, (dim_in, n_out), jnp.float32,
                           minval=-limit, maxval=limit)
    b = jnp.zeros((n_out,), jnp.float32)

    # Small-shape check (single block path).
    Xs = jax.random.normal(kx, (batch, dim_in), jnp.float32)
    out = model_head(Xs, W, b)
    jax.block_until_ready(out)
    ref = jnp.maximum(Xs, 0.0) @ W + b
    assert out.shape == (batch, n_out)
    assert jnp.allclose(out, ref, atol=1e-5), "mismatch vs reference (small)"

    # Larger batch: exercises budget-derived tiling and the >=2-step grid.
    Xl = jax.random.normal(kx2, (2048, dim_in), jnp.float32)
    out_l = model_head(Xl, W, b)
    jax.block_until_ready(out_l)
    ref_l = jnp.maximum(Xl, 0.0) @ W + b
    assert jnp.allclose(out_l, ref_l, atol=1e-5), "mismatch vs reference (tiled)"

    # Non-8-aligned batch: exercises the masked ragged last block (no fallback).
    Xu = jax.random.normal(kx3, (1003, dim_in), jnp.float32)
    out_u = model_head(Xu, W, b)
    jax.block_until_ready(out_u)
    ref_u = jnp.maximum(Xu, 0.0) @ W + b
    assert out_u.shape == (1003, n_out)
    assert jnp.allclose(out_u, ref_u, atol=1e-5), "mismatch vs reference (ragged)"

    print("KERNEL_OK")
</pallas_src>

<mosaic_0001>
module attributes {stable_mosaic.version = 11 : i64} {
  func.func @_head_kernel(%arg0: i32, %arg1: memref<8x32xf32, #tpu.memory_space<vmem>>, %arg2: memref<32x10xf32, #tpu.memory_space<vmem>>, %arg3: memref<1x10xf32, #tpu.memory_space<vmem>>, %arg4: memref<8x10xf32, #tpu.memory_space<vmem>>) attributes {dimension_semantics = [#tpu.dimension_semantics<parallel>], iteration_bounds = array<i64: 1>, scalar_prefetch = 0 : i64, scratch_operands = 0 : i64, tpu.core_type = #tpu.core_type<tc>, window_params = [{transform_indices = @transform_0, window_bounds = array<i64: 8, 32>}, {pipeline_mode = #tpu.pipeline_mode<synchronous>, transform_indices = @transform_1, window_bounds = array<i64: 32, 10>}, {pipeline_mode = #tpu.pipeline_mode<synchronous>, transform_indices = @transform_2, window_bounds = array<i64: 1, 10>}, {transform_indices = @transform_3, window_bounds = array<i64: 8, 10>}]} {
    %c0 = arith.constant 0 : index
    %c0_0 = arith.constant 0 : index
    %0 = vector.load %arg1[%c0, %c0_0] : memref<8x32xf32, #tpu.memory_space<vmem>>, vector<8x32xf32>
    %cst = arith.constant 0.000000e+00 : f32
    %1 = vector.broadcast %cst : f32 to vector<8x32xf32>
    %2 = arith.maximumf %0, %1 : vector<8x32xf32>
    %c0_1 = arith.constant 0 : index
    %c0_2 = arith.constant 0 : index
    %3 = vector.load %arg2[%c0_1, %c0_2] : memref<32x10xf32, #tpu.memory_space<vmem>>, vector<32x10xf32>
    %cst_3 = arith.constant dense<0.000000e+00> : vector<8x10xf32>
    %4 = tpu.matmul %2, %3, %cst_3 {dimension_numbers = #tpu.dot_dimension_numbers<[1], [0], [0], [1], [0, 0, 1, 1], [], []>} : vector<8x32xf32>, vector<32x10xf32>, vector<8x10xf32> -> vector<8x10xf32>
    %c0_4 = arith.constant 0 : index
    %c0_5 = arith.constant 0 : index
    %5 = vector.load %arg3[%c0_4, %c0_5] : memref<1x10xf32, #tpu.memory_space<vmem>>, vector<1x10xf32>
    %6 = vector.broadcast %5 : vector<1x10xf32> to vector<8x10xf32>
    %7 = arith.addf %4, %6 : vector<8x10xf32>
    %c0_6 = arith.constant 0 : index
    %c0_7 = arith.constant 0 : index
    %8 = vector.load %arg4[%c0_6, %c0_7] : memref<8x10xf32, #tpu.memory_space<vmem>>, vector<8x10xf32>
    tpu.vector_store %arg4[%c0_6, %c0_7], %7 {strides = array<i32>} : memref<8x10xf32, #tpu.memory_space<vmem>>, vector<8x10xf32>,
    return
  }
  func.func @transform_0(%arg0: i32) -> (i32, i32) {
    %c0_i32 = arith.constant 0 : i32
    %c0_i32_0 = arith.constant 0 : i32
    return %arg0, %c0_i32 : i32, i32
  }
  func.func @transform_1(%arg0: i32) -> (i32, i32) {
    %c0_i32 = arith.constant 0 : i32
    %c0_i32_0 = arith.constant 0 : i32
    %c0_i32_1 = arith.constant 0 : i32
    return %c0_i32, %c0_i32_0 : i32, i32
  }
  func.func @transform_2(%arg0: i32) -> (i32, i32) {
    %c0_i32 = arith.constant 0 : i32
    %c0_i32_0 = arith.constant 0 : i32
    %c0_i32_1 = arith.constant 0 : i32
    return %c0_i32, %c0_i32_0 : i32, i32
  }
  func.func @transform_3(%arg0: i32) -> (i32, i32) {
    %c0_i32 = arith.constant 0 : i32
    %c0_i32_0 = arith.constant 0 : i32
    return %arg0, %c0_i32 : i32, i32
  }
}

</mosaic_0001>

<bundles_post_ra>
// kernel: tpu_custom_call.1
= control target key start
LH: loop header
LB: loop body
LE: loop exit
PB: predicated region body
PF: predicated region fallthrough
CT: control target
= control target key end

     0   :  { %v170_v3 = vmov 0.0|0.0   ;;  %vm171_vm0 = vmmov 0   ;;  %v172_v6 = vmov 0.0   ;;  %s224_s0 = inlined_call_operand.vmem [shape: f32[8,32], index: 0, kind: input, shape index: {}]   ;;  %s225_s1 = inlined_call_operand.vmem [shape: f32[32,10], index: 1, kind: input, shape index: {}]   ;;  %s226_s2 = inlined_call_operand.vmem [shape: f32[1,10], index: 2, kind: input, shape index: {}]   ;;  %s227_s3 = inlined_call_operand.hbm [shape: f32[8,10], index: 3, kind: output, shape index: {}]  }
   0x1   :  { %v17_v0 = vld [vmem:[%s225_s1] sm:$0xff]  ;;  %v18_v1 = vld [vmem:[%s225_s1 + $0x8] sm:$0xff]  ;;  %v19_v2 = vld [vmem:[%s225_s1 + $0x10] sm:$0xff]  ;;  %136 = vmatprep.subr.bf16.mxu0 %v170_v3  ;;  %133 = vmatprep.mubr.msk.f32.mxu0 %vm171_vm0, %v172_v6 }
   0x2   :  { %v137_v4 = vpack.c.bf16 %v18_v1, %v17_v0  ;;  %v20_v5 = vld [vmem:[%s225_s1 + $0x18] sm:$0xff] }
   0x3   :  { %8 = vsyncpa [#allocation3], 0  ;;  %v140_v7 = vpack.c.bf16 %v20_v5, %v19_v2  ;;  %v15_v8 = vld [vmem:[%s224_s0] sm:$0xff]  ;;  %vm28_vm1 = vcmask 261120   ;;  %s173_s1 = smov [#allocation2]   ;;  %vm102_vm2 = vcmask 80896  }
   0x4   :  { %138 = vmatpush3.bf16.msra.mxu0 %v137_v4  ;;  %v16_v9 = vmax.f32 %v15_v8, 0.0  ;;  %v118_v10 = vld [vmem:[%s226_s2] ss:$0 sm:$0xff]  ;;  %s110_s24 = sshll.u32 %s173_s1, 4  ;;  %s111_s24 = int_to_ptr.vmem [resolvable:$true] %s110_s24 }
   0x5   :  { %139 = vmatprep.subr.bf16.mxu0 %v170_v3  ;;  %s146_s25 = scalar_lea.vmem %s111_s24, 128  ;;  %p151_p1 = scmp.lt.s32.totalorder %s111_s24, %s111_s24 }
   0x6   :  { %p147_p0 = scmp.ne.s32.totalorder %s111_s24, %s146_s25  ;;  %p152_p2 = scmp.lt.s32.totalorder %s146_s25, %s146_s25 }
   0x8   :  { %141 = vmatpush3.bf16.msra.mxu0 %v140_v7  ;;  %p153_p3 = por %p152_p2, %p151_p1 }
   0xa   :  { %p154_p4 = pnand %p153_p3, %p147_p0 }
   0xb   :  { %134 = vmatmul.mubr.msk.f32.vlgmr.msra.gmra.mrb[0].mxu0 %vm28_vm1, %v16_v9 }
  0xde   :  { %v98_v11 = vpop.f32.mrb[0].mxu0 }
  0xdf   :  { %v99_v12 = vadd.f32 %v118_v10, %v98_v11  ;;  %v135_v13 = vpop.f32.mrb[1].mxu0 }
  0xe1   :  { %103 = vst.msk [vmem:[#allocation2] sm:$0xff] %vm102_vm2, %v99_v12 }
  0xe2   :  { %157 = shalt.err (!%p154_p4)
}
  0xe3   :  { %s158_s27 = scalar_lea.hbm %s227_s3, 128 }
  0xe4   :  { %p159_p5 = scmp.ne.s32.totalorder %s227_s3, %s158_s27  ;;  %p162_p6 = scmp.lt.u32.totalorder %s158_s27, %s227_s3 }
  0xe6   :  { %p164_p7 = pnand %p162_p6, %p159_p5 }
  0xe8   :  { %167 = shalt.err (!%p164_p7)
}
  0xe9   :  { %113 = dma.vmem_to_hbm [thread:$0]  %s111_s24, 128, %s227_s3, [#allocation3]  }
  0xea   :  { %168 = dma.done.wait [#allocation3], 128  }
  0xeb   :  { %169 = vsyncadd [#allocation3], 4294967168 }
  0xec   :  { %117 = vsyncpa [#allocation3], 1 }

</bundles_post_ra>
